<compile_context>
chip_gen: v6e
topology: v6e:2x2x1
jax: 0.10.0
libtpu: 0.0.40
codegen_flags: <defaults>
</compile_context>

<pallas_src>
import functools

import jax
import jax.numpy as jnp
from jax.experimental import pallas as pl
from jax.experimental.pallas import tpu as pltpu


def _round_up(a: int, b: int) -> int:
    return ((a + b - 1) // b) * b


def _rp_kernel_bias(x_ref, w_ref, b_ref, o_ref, acc_ref):
    # x_ref: (tm, tk) bf16, w_ref: (tk, tn) bf16, b_ref: (1, tn) f32,
    # o_ref: (tm, tn) f32, acc_ref: (tm, tn) f32 scratch
    @pl.when(pl.program_id(2) == 0)
    def _():
        acc_ref[...] = jnp.zeros_like(acc_ref)

    acc_ref[...] += jnp.dot(
        x_ref[...], w_ref[...], preferred_element_type=jnp.float32
    )

    @pl.when(pl.program_id(2) == pl.num_programs(2) - 1)
    def _():
        o_ref[...] = jnp.tanh(acc_ref[...] + b_ref[...]).astype(o_ref.dtype)


def _rp_kernel_nobias(x_ref, w_ref, o_ref, acc_ref):
    @pl.when(pl.program_id(2) == 0)
    def _():
        acc_ref[...] = jnp.zeros_like(acc_ref)

    acc_ref[...] += jnp.dot(
        x_ref[...], w_ref[...], preferred_element_type=jnp.float32
    )

    @pl.when(pl.program_id(2) == pl.num_programs(2) - 1)
    def _():
        o_ref[...] = jnp.tanh(acc_ref[...]).astype(o_ref.dtype)


@functools.partial(jax.jit, static_argnames=("tile_m", "tile_n", "tile_k"))
def _random_projection_impl(x, weight_t_bf16, bias2d, *, tile_m, tile_n, tile_k):
    """Core pallas_call.  Inputs are already padded & cast; bias2d may be None."""
    M_p, K_p = x.shape
    _, N_p = weight_t_bf16.shape
    grid = (M_p // tile_m, N_p // tile_n, K_p // tile_k)

    in_specs = [
        pl.BlockSpec((tile_m, tile_k), lambda i, j, k: (i, k)),   # x tile (bf16)
        pl.BlockSpec((tile_k, tile_n), lambda i, j, k: (k, j)),   # W^T tile (bf16)
    ]
    args = [x, weight_t_bf16]
    if bias2d is not None:
        in_specs.append(pl.BlockSpec((1, tile_n), lambda i, j, k: (0, j)))
        args.append(bias2d)
        kernel = _rp_kernel_bias
    else:
        kernel = _rp_kernel_nobias

    # VMEM budget: double-buffered input/output tiles + f32 accumulator.
    tile_bytes = (
        2 * (tile_m * tile_k * 2)        # x tile, bf16, double-buffered
        + 2 * (tile_k * tile_n * 2)      # weight tile, bf16, double-buffered
        + 2 * (tile_n * 4)               # bias tile, f32
        + 2 * (tile_m * tile_n * 4)      # output tile, f32
        + tile_m * tile_n * 4            # accumulator scratch
    )
    vmem_limit = min(max(tile_bytes + (4 << 20), 32 << 20), 64 << 20)

    cost = pl.CostEstimate(
        flops=2 * M_p * N_p * K_p,
        transcendentals=M_p * N_p,                       # tanh per output element
        bytes_accessed=(M_p * K_p * 2 + K_p * N_p * 2
                        + (N_p * 4 if bias2d is not None else 0)
                        + M_p * N_p * 4),
    )

    return pl.pallas_call(
        kernel,
        out_shape=jax.ShapeDtypeStruct((M_p, N_p), jnp.float32),
        grid_spec=pltpu.PrefetchScalarGridSpec(
            num_scalar_prefetch=0,
            grid=grid,
            in_specs=in_specs,
            out_specs=pl.BlockSpec((tile_m, tile_n), lambda i, j, k: (i, j)),
            scratch_shapes=[pltpu.VMEM((tile_m, tile_n), jnp.float32)],
        ),
        compiler_params=pltpu.CompilerParams(
            dimension_semantics=("parallel", "parallel", "arbitrary"),
            vmem_limit_bytes=vmem_limit,
        ),
        cost_estimate=cost,
    )(*args)


def random_projection(x, weight, bias=None, *, tile_m=None, tile_n=None, tile_k=None):
    """tanh(x @ weight.T + bias) via a Pallas TPU kernel.

    x:      [M, K]  float32
    weight: [N, K]  float32 (torch F.linear layout)
    bias:   [N]     float32 or None
    returns [M, N]  float32
    """
    M, K = x.shape
    N, K2 = weight.shape
    assert K == K2, "in_features mismatch"

    # --- tile selection (multiples of 8 on sublane / 128 on lane axes) ------
    if tile_n is None:
        tile_n = min(_round_up(N, 128), 512)
    if tile_k is None:
        tile_k = min(_round_up(K, 128), 512)
    if tile_m is None:
        tile_m = min(_round_up(M, 16), 512)
    assert tile_m % 8 == 0 and tile_n % 128 == 0 and tile_k % 128 == 0

    M_p = _round_up(M, tile_m)
    K_p = _round_up(K, tile_k)
    N_p = _round_up(N, tile_n)

    # --- pad + cast (weight transpose / cast is a one-time cost: the
    #     reservoir weight is fixed) -----------------------------------------
    x_p = jnp.pad(x, ((0, M_p - M), (0, K_p - K))).astype(jnp.bfloat16)
    w_t = jnp.pad(weight, ((0, N_p - N), (0, K_p - K))).T.astype(jnp.bfloat16)

    bias2d = None
    if bias is not None:
        bias2d = jnp.pad(bias, (0, N_p - N)).astype(jnp.float32).reshape(1, N_p)

    out_p = _random_projection_impl(
        x_p, w_t, bias2d, tile_m=tile_m, tile_n=tile_n, tile_k=tile_k
    )
    return out_p[:M, :N].astype(x.dtype)


if __name__ == "__main__":
    key = jax.random.PRNGKey(0)
    kx, kw, kb = jax.random.split(key, 3)

    batch = 16
    in_features = 32
    out_features = 64

    x = jax.random.normal(kx, (batch, in_features), dtype=jnp.float32)
    # Deterministic "reservoir" weight / bias initialization (synthetic).
    weight = jax.random.uniform(
        kw, (out_features, in_features), dtype=jnp.float32, minval=-1.0, maxval=1.0)
    bias = jax.random.uniform(
        kb, (out_features,), dtype=jnp.float32, minval=-0.1, maxval=0.1)

    # Bias path.
    out = jax.block_until_ready(random_projection(x, weight, bias))
    ref = jnp.tanh(x @ weight.T + bias)
    assert out.shape == (batch, out_features)
    # bf16 MXU inputs with f32 accumulation: loose tolerance is expected and
    # irrelevant for a random projection.
    assert jnp.allclose(out, ref, atol=2e-2, rtol=2e-2), float(
        jnp.max(jnp.abs(out - ref)))

    # No-bias path (module default bias=False): skips the bias add entirely.
    out_nb = jax.block_until_ready(random_projection(x, weight, None))
    ref_nb = jnp.tanh(x @ weight.T)
    assert jnp.allclose(out_nb, ref_nb, atol=2e-2, rtol=2e-2), float(
        jnp.max(jnp.abs(out_nb - ref_nb)))

    print("KERNEL_OK")
</pallas_src>

<mosaic_0001>
module attributes {stable_mosaic.version = 11 : i64} {
  func.func @_rp_kernel_bias(%arg0: i32, %arg1: i32, %arg2: i32, %arg3: memref<16x128xbf16, #tpu.memory_space<vmem>>, %arg4: memref<128x128xbf16, #tpu.memory_space<vmem>>, %arg5: memref<1x128xf32, #tpu.memory_space<vmem>>, %arg6: memref<16x128xf32, #tpu.memory_space<vmem>>, %arg7: memref<16x128xf32, #tpu.memory_space<vmem>>) attributes {dimension_semantics = [#tpu.dimension_semantics<parallel>, #tpu.dimension_semantics<parallel>, #tpu.dimension_semantics<arbitrary>], iteration_bounds = array<i64: 1, 1, 1>, scalar_prefetch = 0 : i64, scratch_operands = 1 : i64, tpu.core_type = #tpu.core_type<tc>, window_params = [{transform_indices = @transform_0, window_bounds = array<i64: 16, 128>}, {transform_indices = @transform_1, window_bounds = array<i64: 128, 128>}, {transform_indices = @transform_2, window_bounds = array<i64: 1, 128>}, {transform_indices = @transform_3, window_bounds = array<i64: 16, 128>}]} {
    %c0_i32 = arith.constant 0 : i32
    %0 = arith.cmpi eq, %arg2, %c0_i32 : i32
    %1 = arith.extui %0 : i1 to i32
    %c0_i32_0 = arith.constant 0 : i32
    %2 = arith.cmpi ne, %1, %c0_i32_0 : i32
    scf.if %2 {
      %cst_10 = arith.constant 0.000000e+00 : f32
      %12 = vector.broadcast %cst_10 : f32 to vector<16x128xf32>
      %c0_11 = arith.constant 0 : index
      %c0_12 = arith.constant 0 : index
      %13 = vector.load %arg7[%c0_11, %c0_12] : memref<16x128xf32, #tpu.memory_space<vmem>>, vector<16x128xf32>
      tpu.vector_store %arg7[%c0_11, %c0_12], %12 {strides = array<i32>} : memref<16x128xf32, #tpu.memory_space<vmem>>, vector<16x128xf32>,
    } else {
    }
    %c0 = arith.constant 0 : index
    %c0_1 = arith.constant 0 : index
    %3 = vector.load %arg7[%c0, %c0_1] : memref<16x128xf32, #tpu.memory_space<vmem>>, vector<16x128xf32>
    %c0_2 = arith.constant 0 : index
    %c0_3 = arith.constant 0 : index
    %4 = vector.load %arg3[%c0_2, %c0_3] : memref<16x128xbf16, #tpu.memory_space<vmem>>, vector<16x128xbf16>
    %c0_4 = arith.constant 0 : index
    %c0_5 = arith.constant 0 : index
    %5 = vector.load %arg4[%c0_4, %c0_5] : memref<128x128xbf16, #tpu.memory_space<vmem>>, vector<128x128xbf16>
    %cst = arith.constant dense<0.000000e+00> : vector<16x128xf32>
    %6 = tpu.matmul %4, %5, %cst {dimension_numbers = #tpu.dot_dimension_numbers<[1], [0], [0], [1], [0, 0, 1, 1], [], []>} : vector<16x128xbf16>, vector<128x128xbf16>, vector<16x128xf32> -> vector<16x128xf32>
    %7 = arith.addf %3, %6 : vector<16x128xf32>
    %c0_6 = arith.constant 0 : index
    %c0_7 = arith.constant 0 : index
    %8 = vector.load %arg7[%c0_6, %c0_7] : memref<16x128xf32, #tpu.memory_space<vmem>>, vector<16x128xf32>
    tpu.vector_store %arg7[%c0_6, %c0_7], %7 {strides = array<i32>} : memref<16x128xf32, #tpu.memory_space<vmem>>, vector<16x128xf32>,
    %c0_i32_8 = arith.constant 0 : i32
    %9 = arith.cmpi eq, %arg2, %c0_i32_8 : i32
    %10 = arith.extui %9 : i1 to i32
    %c0_i32_9 = arith.constant 0 : i32
    %11 = arith.cmpi ne, %10, %c0_i32_9 : i32
    scf.if %11 {
      %c0_10 = arith.constant 0 : index
      %c0_11 = arith.constant 0 : index
      %12 = vector.load %arg7[%c0_10, %c0_11] : memref<16x128xf32, #tpu.memory_space<vmem>>, vector<16x128xf32>
      %c0_12 = arith.constant 0 : index
      %c0_13 = arith.constant 0 : index
      %13 = vector.load %arg5[%c0_12, %c0_13] : memref<1x128xf32, #tpu.memory_space<vmem>>, vector<1x128xf32>
      %14 = vector.broadcast %13 : vector<1x128xf32> to vector<16x128xf32>
      %15 = arith.addf %12, %14 : vector<16x128xf32>
      %16 = math.tanh %15 : vector<16x128xf32>
      %c0_14 = arith.constant 0 : index
      %c0_15 = arith.constant 0 : index
      %17 = vector.load %arg6[%c0_14, %c0_15] : memref<16x128xf32, #tpu.memory_space<vmem>>, vector<16x128xf32>
      tpu.vector_store %arg6[%c0_14, %c0_15], %16 {strides = array<i32>} : memref<16x128xf32, #tpu.memory_space<vmem>>, vector<16x128xf32>,
    } else {
    }
    return
  }
  func.func @transform_0(%arg0: i32, %arg1: i32, %arg2: i32) -> (i32, i32) {
    %c0_i32 = arith.constant 0 : i32
    return %arg0, %arg2 : i32, i32
  }
  func.func @transform_1(%arg0: i32, %arg1: i32, %arg2: i32) -> (i32, i32) {
    %c0_i32 = arith.constant 0 : i32
    return %arg2, %arg1 : i32, i32
  }
  func.func @transform_2(%arg0: i32, %arg1: i32, %arg2: i32) -> (i32, i32) {
    %c0_i32 = arith.constant 0 : i32
    %c0_i32_0 = arith.constant 0 : i32
    return %c0_i32, %arg1 : i32, i32
  }
  func.func @transform_3(%arg0: i32, %arg1: i32, %arg2: i32) -> (i32, i32) {
    %c0_i32 = arith.constant 0 : i32
    return %arg0, %arg1 : i32, i32
  }
}

</mosaic_0001>

<bundles_post_ra>
// kernel: _random_projection_impl.1
= control target key start
LH: loop header
LB: loop body
LE: loop exit
PB: predicated region body
PF: predicated region fallthrough
CT: control target
= control target key end

     0   :  { %8 = vsyncpa [#allocation4], 0  ;;  %s373_s0 = inlined_call_operand.hbm [shape: bf16[16,128], index: 0, kind: input, shape index: {}]   ;;  %s374_s1 = inlined_call_operand.hbm [shape: bf16[128,128], index: 1, kind: input, shape index: {}]   ;;  %s375_s2 = inlined_call_operand.vmem [shape: f32[1,128], index: 2, kind: input, shape index: {}]   ;;  %s376_s3 = inlined_call_operand.hbm [shape: f32[16,128], index: 3, kind: output, shape index: {}]  }
   0x1   :  { %9 = vsyncpa [#allocation7], 0 }
   0x2   :  { %10 = vsyncpa [#allocation5], 0  ;;  %s332_s12 = smov [#allocation3]  }
   0x3   :  { %s16_s13 = sshll.u32 %s332_s12, 4  ;;  %s17_s13 = int_to_ptr.vmem [resolvable:$true] %s16_s13 }
   0x4   :  { %s274_s14 = scalar_lea.vmem %s17_s13, 128  ;;  %p279_p1 = scmp.lt.s32.totalorder %s17_s13, %s17_s13 }
   0x5   :  { %p275_p0 = scmp.ne.s32.totalorder %s17_s13, %s274_s14  ;;  %p280_p2 = scmp.lt.s32.totalorder %s274_s14, %s274_s14 }
   0x7   :  { %p281_p3 = por %p280_p2, %p279_p1 }
   0x9   :  { %p282_p4 = pnand %p281_p3, %p275_p0 }
   0xb   :  { %285 = shalt.err (!%p282_p4)
}
   0xc   :  { %s333_s15 = smov 64   ;;  %s334_s16 = smov 4  }
   0xd   :  { %22 = dma.hbm_to_vmem [thread:$0]  %s373_s0, 128, %s17_s13, [#allocation4], %s333_s15, %s333_s15, %s334_s16  }
   0xe   :  { %s335_s19 = smov [#allocation6]  }
   0xf   :  { %s28_s20 = sshll.u32 %s335_s19, 4  ;;  %s29_s20 = int_to_ptr.vmem [resolvable:$true] %s28_s20 }
  0x10   :  { %s294_s21 = scalar_lea.vmem %s29_s20, 1024  ;;  %p299_p6 = scmp.lt.s32.totalorder %s29_s20, %s29_s20 }
  0x11   :  { %p295_p5 = scmp.ne.s32.totalorder %s29_s20, %s294_s21  ;;  %p300_p7 = scmp.lt.s32.totalorder %s294_s21, %s294_s21 }
  0x13   :  { %p301_p8 = por %p300_p7, %p299_p6 }
  0x15   :  { %p302_p9 = pnand %p301_p8, %p295_p5 }
  0x17   :  { %305 = shalt.err (!%p302_p9)
}
  0x18   :  { %34 = dma.hbm_to_vmem [thread:$0]  %s374_s1, 1024, %s29_s20, [#allocation7], %s333_s15, %s333_s15, %s334_s16  }
  0x19   :  { %326 = dma.done.wait [#allocation4], 128  }
  0x1a   :  { %327 = vsyncadd [#allocation4], 4294967168 }
  0x1b   :  { %328 = dma.done.wait [#allocation7], 1024  }
  0x1c   :  { %329 = vsyncadd [#allocation7], 4294966272  ;;  %v336_v0 = vmov 0.0   ;;  %vm337_vm0 = vmmov 0   ;;  %v253_v1 = vld [vmem:[#allocation6 + $0x38] sm:$0xff]   ;;  %v254_v2 = vld [vmem:[#allocation6 + $0x30] sm:$0xff]  }
  0x1d   :  { %224 = vmatprep.subr.bf16.mxu0 %v336_v0  ;;  %240 = vmatprep.mubr.msk.bf16.mxu0 %vm337_vm0, %v336_v0  ;;  %v255_v3 = vld [vmem:[#allocation6 + $0x28] sm:$0xff]   ;;  %v256_v4 = vld [vmem:[#allocation6 + $0x20] sm:$0xff]   ;;  %v257_v5 = vld [vmem:[#allocation6 + $0x18] sm:$0xff]   ;;  %s338_s24 = smov [#allocation8]  }
  0x1e   :  { %225 = vmatpush3.bf16.msra.mxu0 %v253_v1  ;;  %v258_v6 = vld [vmem:[#allocation6 + $0x10] sm:$0xff]   ;;  %v259_v7 = vld [vmem:[#allocation6 + $0x8] sm:$0xff]   ;;  %v260_v8 = vld [vmem:[#allocation6] sm:$0xff]   ;;  %s192_s25 = sshll.u32 %s338_s24, 4  ;;  %s193_s25 = int_to_ptr.vmem [resolvable:$true] %s192_s25 }
  0x1f   :  { %226 = vmatprep.subr.bf16.mxu0 %v336_v0  ;;  %v261_v9 = vld [vmem:[#allocation3] sm:$0xff]   ;;  %s306_s26 = scalar_lea.vmem %s193_s25, 256  ;;  %p311_p11 = scmp.lt.s32.totalorder %s193_s25, %s193_s25 }
  0x20   :  { %v214_v10 = vld [vmem:[%s375_s2] ss:$0 sm:$0xff]  ;;  %p307_p10 = scmp.ne.s32.totalorder %s193_s25, %s306_s26  ;;  %p312_p12 = scmp.lt.s32.totalorder %s306_s26, %s306_s26 }
  0x22   :  { %227 = vmatpush3.bf16.msra.mxu0 %v254_v2  ;;  %p313_p13 = por %p312_p12, %p311_p11 }
  0x23   :  { %228 = vmatprep.subr.bf16.mxu0 %v336_v0 }
  0x24   :  { %p314_p0 = pnand %p313_p13, %p307_p10 }
  0x26   :  { %229 = vmatpush3.bf16.msra.mxu0 %v255_v3 }
  0x27   :  { %230 = vmatprep.subr.bf16.mxu0 %v336_v0 }
  0x2a   :  { %231 = vmatpush3.bf16.msra.mxu0 %v256_v4 }
  0x2b   :  { %232 = vmatprep.subr.bf16.mxu0 %v336_v0 }
  0x2e   :  { %233 = vmatpush3.bf16.msra.mxu0 %v257_v5 }
  0x2f   :  { %234 = vmatprep.subr.bf16.mxu0 %v336_v0 }
  0x32   :  { %235 = vmatpush3.bf16.msra.mxu0 %v258_v6 }
  0x33   :  { %236 = vmatprep.subr.bf16.mxu0 %v336_v0 }
  0x36   :  { %237 = vmatpush3.bf16.msra.mxu0 %v259_v7 }
  0x37   :  { %238 = vmatprep.subr.bf16.mxu0 %v336_v0 }
  0x3a   :  { %239 = vmatpush3.bf16.msra.mxu0 %v260_v8 }
  0x3d   :  { %241 = vmatmul.mubr.bf16.vlgmr.msra.gmra.mxu0 %v261_v9 }
  0xfd   :  { %v158_v11 = vpop.f32.mrf.mxu0 }
  0xfe   :  { %v181_v12 = vadd.f32 %v214_v10, %v158_v11 }
  0xff   :  { %v242_v13 = vpop.f32.mrf.mxu0 }
 0x100   :  { %262 = vtanh.f32 %v181_v12 }
 0x101   :  { %v161_v14 = vpop.f32.mrf.mxu0 }
 0x102   :  { %v182_v15 = vadd.f32 %v214_v10, %v161_v14 }
 0x103   :  { %v243_v16 = vpop.f32.mrf.mxu0 }
 0x104   :  { %264 = vtanh.f32 %v182_v15 }
 0x10d   :  { %v263_v17 = vpop.eup %262 }
 0x10e   :  { %185 = vst [vmem:[#allocation8] sm:$0xff] %v263_v17 }
 0x111   :  { %v265_v18 = vpop.eup %264 }
 0x112   :  { %186 = vst [vmem:[#allocation8 + $0x8] sm:$0xff] %v265_v18 }
 0x113   :  { %317 = shalt.err (!%p314_p0)
}
 0x114   :  { %s339_s2 = smov 128   ;;  %s340_s27 = smov 8  }
 0x115   :  { %198 = dma.vmem_to_hbm [thread:$0]  %s193_s25, 256, %s376_s3, [#allocation5], %s339_s2, %s339_s2, %s340_s27  }
 0x116   :  { %330 = dma.done.wait [#allocation5], 256  }
 0x117   :  { %331 = vsyncadd [#allocation5], 4294967040 }
 0x118   :  { %202 = vsyncpa [#allocation4], 1 }
 0x119   :  { %203 = vsyncpa [#allocation7], 1 }
 0x11a   :  { %204 = vsyncpa [#allocation5], 1 }

</bundles_post_ra>
